<compile_context>
chip_gen: v6e
topology: v6e:2x2x1
jax: 0.10.0
libtpu: 0.0.40
codegen_flags: <defaults>
</compile_context>

<pallas_src>
import functools

import numpy as np
import jax
import jax.numpy as jnp
from jax import lax
from jax.experimental import pallas as pl
from jax.experimental.pallas import tpu as pltpu


# ----------------------------- gate construction (host-side JAX) -------------

def _rx(t):
    c = jnp.cos(t / 2).astype(jnp.complex64)
    s = jnp.sin(t / 2).astype(jnp.complex64)
    return jnp.stack([jnp.stack([c, -1j * s]), jnp.stack([-1j * s, c])])


def _ry(t):
    c = jnp.cos(t / 2).astype(jnp.complex64)
    s = jnp.sin(t / 2).astype(jnp.complex64)
    return jnp.stack([jnp.stack([c, -s]), jnp.stack([s, c])])


def _rz(t):
    e = jnp.exp(-1j * t.astype(jnp.complex64) / 2)
    z = jnp.zeros((), jnp.complex64)
    return jnp.stack([jnp.stack([e, z]), jnp.stack([z, jnp.conj(e)])])


def _cnot_matrix(num_qubits, control, target):
    d = 2 ** num_qubits
    u = np.zeros((d, d), np.complex64)
    for b in range(d):
        if (b >> (num_qubits - 1 - control)) & 1:
            nb = b ^ (1 << (num_qubits - 1 - target))
        else:
            nb = b
        u[nb, b] = 1.0
    return u


def _build_layer_unitaries(params, num_qubits, num_layers):
    """Per-layer unitary U_l = CNOT_ring @ (kron_j RZ RY RX), complex64 (L,D,D).
    Wire 0 is the MOST significant bit of the basis index (PennyLane order)."""
    d = 2 ** num_qubits
    ring = np.eye(d, dtype=np.complex64)
    for j in range(num_qubits):
        ring = _cnot_matrix(num_qubits, j, (j + 1) % num_qubits) @ ring
    ring = jnp.asarray(ring)

    layers = []
    for i in range(num_layers):
        gates = [
            _rz(params[i, j, 2]) @ _ry(params[i, j, 1]) @ _rx(params[i, j, 0])
            for j in range(num_qubits)
        ]
        rot = functools.reduce(jnp.kron, gates)     # wire 0 most significant
        layers.append(ring @ rot)                   # full layer unitary
    return jnp.stack(layers)


def _fuse_segments_T(layer_us, seg_bounds, dtype):
    """Fuse consecutive layers between measurement points and transpose for the
    row-vector kernel convention (s_row @ U^T).  Returns (real, imag) stacks of
    shape (num_segments, D, D) cast to `dtype`."""
    ur, ui = [], []
    for lo, hi in seg_bounds:
        u = layer_us[lo]
        for l in range(lo + 1, hi + 1):
            u = layer_us[l] @ u                     # chronological composition
        ut = u.T
        ur.append(jnp.real(ut).astype(dtype))
        ui.append(jnp.imag(ut).astype(dtype))
    return jnp.stack(ur), jnp.stack(ui)


# ----------------------------- Pallas kernel ---------------------------------

def _mcm_kernel(ur_ref, ui_ref, sinit_ref, mask_ref, out_ref, s_ref, p_ref):
    """One grid step = one fused segment.

    s_ref   : (8, D) f32 VMEM scratch; packed complex state (Re row 0, Im row 4,
              other sublanes stay exactly zero).
    ur/ui   : (1, D, D) real / imag parts of this segment's unitary^T.
    mask_ref: (1, 8, D) measurement bit masks for this segment (row m is the
              bitmask of measurement m's wire if measured here, else 0).
    p_ref   : (8, 128) f32 VMEM scratch; row m accumulates P(wire_m == 1).
    out_ref : (8, 128) written once at the final grid step.
    """
    seg = pl.program_id(0)

    @pl.when(seg == 0)
    def _init():
        s_ref[...] = sinit_ref[...]
        p_ref[...] = jnp.zeros_like(p_ref)

    s = s_ref[...]
    u_r = ur_ref[0].astype(jnp.float32)
    u_i = ui_ref[0].astype(jnp.float32)

    # Complex update with 2 real matmuls on the packed state:
    #   A = S @ Ur, B = S @ Ui; swap sublanes 0<->4 of B (roll by 4, XLU) and
    #   recombine with a per-row sign:  Re' = A[0] - B[4],  Im' = A[4] + B[0].
    a = jnp.dot(s, u_r, preferred_element_type=jnp.float32)
    b = jnp.dot(s, u_i, preferred_element_type=jnp.float32)
    b_swap = pltpu.roll(b, shift=4, axis=0)
    row = lax.broadcasted_iota(jnp.int32, (8, 1), 0)
    sign = jnp.where(row == 0, -1.0, 1.0).astype(jnp.float32)
    s_new = a + sign * b_swap
    s_ref[...] = s_new

    # |amp|^2 once per segment (rows other than 0 and 4 are exactly zero).
    dens = jnp.sum(s_new * s_new, axis=0, keepdims=True)            # (1, D)
    # Per-measurement P(1); unmeasured rows have a zero mask -> contribute 0.
    p_rows = jnp.sum(dens * mask_ref[0], axis=-1, keepdims=True)    # (8, 1)
    p_ref[...] = p_ref[...] + p_rows

    @pl.when(seg == pl.num_programs(0) - 1)
    def _store():
        out_ref[...] = p_ref[...]


# ----------------------------- module wrapper --------------------------------

class MCMCircuitPallas:
    def __init__(self, num_qubits, num_layers, early_exits, key,
                 unitary_dtype=jnp.float32):
        self.num_qubits = num_qubits
        self.num_layers = num_layers
        self.early_exits = list(early_exits)
        self.unitary_dtype = unitary_dtype
        for num in self.early_exits:
            if num >= self.num_layers:
                raise ValueError(f"early exit {num} exceeds num_layers")
        if len(self.early_exits) > 3:
            raise ValueError("more than 3 early exits not supported")

        # params: {layer_i: (num_qubits, 3)} ~ torch.rand -> (L, Q, 3) uniform
        self.params = jax.random.uniform(
            key, (num_layers, num_qubits, 3), dtype=jnp.float32)

        # wire pairs, exactly as the torch module builds them
        self.list_of_pairs = []
        start = 0
        for _ in range(len(self.early_exits)):
            self.list_of_pairs.append([start, start + 1])
            start += 2
        self.list_of_pairs.append([start, start + 1])

        # chronological measurement schedule: layer -> measurement row indices
        self.meas_per_layer = {}
        self.meas_wires = []
        measured_so_far = 0
        for i in range(num_layers):
            if i in self.early_exits:
                for w in self.list_of_pairs[measured_so_far]:
                    self.meas_per_layer.setdefault(i, []).append(
                        len(self.meas_wires))
                    self.meas_wires.append(w)
                measured_so_far += 1
        for w in self.list_of_pairs[-1]:
            self.meas_per_layer.setdefault(num_layers - 1, []).append(
                len(self.meas_wires))
            self.meas_wires.append(w)
        self.num_meas = len(self.meas_wires)        # <= 8 by construction
        self.dim = 2 ** num_qubits

        # segments = runs of layers delimited by measurement points
        boundaries = sorted(set(self.early_exits) | {num_layers - 1})
        self.seg_bounds = []
        prev = -1
        for b in boundaries:
            self.seg_bounds.append((prev + 1, b))
            prev = b
        self.num_segments = len(self.seg_bounds)

        # per-segment bit masks, padded to 8 sublane rows:
        #   seg_masks[s, m, b] = bit of wire(meas m) in basis index b if
        #   measurement m happens at the end of segment s, else 0.
        bidx = np.arange(self.dim)
        seg_masks = np.zeros((self.num_segments, 8, self.dim), np.float32)
        for s, (_, hi) in enumerate(self.seg_bounds):
            for m in self.meas_per_layer.get(hi, []):
                w = self.meas_wires[m]
                seg_masks[s, m, :] = ((bidx >> (num_qubits - 1 - w)) & 1)
        self.seg_masks = jnp.asarray(seg_masks)

        # (num_meas, D) masks for the pure-JAX reference
        ref_masks = np.stack(
            [((bidx >> (num_qubits - 1 - w)) & 1).astype(np.float32)
             for w in self.meas_wires])
        self.ref_masks = jnp.asarray(ref_masks)

    def forward(self, state=None):
        d = self.dim
        if state is None:
            state = jnp.zeros((d,), jnp.complex64).at[0].set(1.0)
        state = state.astype(jnp.complex64)

        layer_us = _build_layer_unitaries(
            self.params, self.num_qubits, self.num_layers)
        ur, ui = _fuse_segments_T(layer_us, self.seg_bounds, self.unitary_dtype)

        # packed state: Re -> sublane 0, Im -> sublane 4, all other rows zero
        sinit = (jnp.zeros((8, d), jnp.float32)
                 .at[0].set(jnp.real(state))
                 .at[4].set(jnp.imag(state)))

        n_seg = self.num_segments
        itemsize = np.dtype(self.unitary_dtype).itemsize
        need = (2 * 2 * d * d * itemsize    # ur + ui segment blocks, double-buffered
                + 2 * 8 * d * 4             # mask block, double-buffered
                + 8 * d * 4                 # resident initial state
                + 8 * d * 4                 # state scratch
                + 2 * 8 * 128 * 4)          # prob scratch + output tile
        vmem_limit = int(min(max(need + (4 << 20), 16 << 20), 64 << 20))
        # TODO(synk): for num_qubits >= 11 a double-buffered (D, D) pair no
        #   longer fits v7x's 64 MiB VMEM; tile the contraction (grid=(S, D//tk))
        #   with a K accumulator if such sizes are needed.

        out = pl.pallas_call(
            _mcm_kernel,
            out_shape=jax.ShapeDtypeStruct((8, 128), jnp.float32),
            grid_spec=pltpu.PrefetchScalarGridSpec(
                num_scalar_prefetch=0,
                grid=(n_seg,),
                in_specs=[
                    pl.BlockSpec((1, d, d), lambda s: (s, 0, 0)),   # Ur per seg
                    pl.BlockSpec((1, d, d), lambda s: (s, 0, 0)),   # Ui per seg
                    pl.BlockSpec((8, d), lambda s: (0, 0)),         # init state
                    pl.BlockSpec((1, 8, d), lambda s: (s, 0, 0)),   # masks
                ],
                out_specs=pl.BlockSpec((8, 128), lambda s: (0, 0)),
                scratch_shapes=[pltpu.VMEM((8, d), jnp.float32),    # state
                                pltpu.VMEM((8, 128), jnp.float32)], # prob acc
            ),
            compiler_params=pltpu.CompilerParams(
                dimension_semantics=("arbitrary",),
                vmem_limit_bytes=vmem_limit),
        )(ur, ui, sinit, self.seg_masks)
        # one P(1) scalar per mid-circuit / final measurement, chronological
        return out[:self.num_meas, 0]

    # pure-JAX reference (layer-by-layer, un-fused) for correctness checking
    def reference(self, state=None):
        d = self.dim
        if state is None:
            state = jnp.zeros((d,), jnp.complex64).at[0].set(1.0)
        layer_us = _build_layer_unitaries(
            self.params, self.num_qubits, self.num_layers)
        s = state.astype(jnp.complex64)
        probs = [None] * self.num_meas
        for i in range(self.num_layers):
            s = layer_us[i] @ s
            for m in self.meas_per_layer.get(i, ()):
                probs[m] = jnp.sum(jnp.abs(s) ** 2 * self.ref_masks[m])
        return jnp.stack(probs)


# ----------------------------- demo ------------------------------------------

if __name__ == "__main__":
    num_qubits = 7          # D = 128 -> one full lane row, MXU-aligned
    num_layers = 4
    early_exits = [1, 2]    # -> pairs [0,1], [2,3], final pair [4,5]

    key = jax.random.PRNGKey(0)
    kp, ks1, ks2 = jax.random.split(key, 3)

    circuit = MCMCircuitPallas(num_qubits, num_layers, early_exits, kp)

    # deterministic random input statevector (normalized complex64)
    d = 2 ** num_qubits
    re = jax.random.normal(ks1, (d,), jnp.float32)
    im = jax.random.normal(ks2, (d,), jnp.float32)
    state = (re + 1j * im).astype(jnp.complex64)
    state = state / jnp.sqrt(jnp.sum(jnp.abs(state) ** 2)).astype(jnp.complex64)

    probs = jax.block_until_ready(circuit.forward(state))
    ref = jax.block_until_ready(circuit.reference(state))

    assert probs.shape == (circuit.num_meas,)
    assert bool(jnp.all(jnp.isfinite(probs)))
    assert bool(jnp.allclose(probs, ref, atol=1e-4)), (probs, ref)

    # optional reduced-precision weight streaming (halves HBM unitary traffic);
    # state / accumulation remain f32, so only the unitaries lose precision.
    circuit_bf16 = MCMCircuitPallas(num_qubits, num_layers, early_exits, kp,
                                    unitary_dtype=jnp.bfloat16)
    probs_bf16 = jax.block_until_ready(circuit_bf16.forward(state))
    assert bool(jnp.all(jnp.isfinite(probs_bf16)))
    assert bool(jnp.allclose(probs_bf16, ref, atol=5e-2)), (probs_bf16, ref)

    print("KERNEL_OK")
</pallas_src>

<mosaic_0001>
module attributes {stable_mosaic.version = 11 : i64} {
  func.func @_mcm_kernel(%arg0: i32, %arg1: memref<1x128x128xf32, #tpu.memory_space<vmem>>, %arg2: memref<1x128x128xf32, #tpu.memory_space<vmem>>, %arg3: memref<8x128xf32, #tpu.memory_space<vmem>>, %arg4: memref<1x8x128xf32, #tpu.memory_space<vmem>>, %arg5: memref<8x128xf32, #tpu.memory_space<vmem>>, %arg6: memref<8x128xf32, #tpu.memory_space<vmem>>, %arg7: memref<8x128xf32, #tpu.memory_space<vmem>>) attributes {dimension_semantics = [#tpu.dimension_semantics<arbitrary>], iteration_bounds = array<i64: 3>, scalar_prefetch = 0 : i64, scratch_operands = 2 : i64, tpu.core_type = #tpu.core_type<tc>, window_params = [{transform_indices = @transform_0, window_bounds = array<i64: 1, 128, 128>}, {transform_indices = @transform_1, window_bounds = array<i64: 1, 128, 128>}, {pipeline_mode = #tpu.pipeline_mode<synchronous>, transform_indices = @transform_2, window_bounds = array<i64: 8, 128>}, {transform_indices = @transform_3, window_bounds = array<i64: 1, 8, 128>}, {pipeline_mode = #tpu.pipeline_mode<synchronous>, transform_indices = @transform_4, window_bounds = array<i64: 8, 128>}]} {
    %c0_i32 = arith.constant 0 : i32
    %0 = arith.cmpi eq, %arg0, %c0_i32 : i32
    %1 = arith.extui %0 : i1 to i32
    %c0_i32_0 = arith.constant 0 : i32
    %2 = arith.cmpi ne, %1, %c0_i32_0 : i32
    scf.if %2 {
      %c0_24 = arith.constant 0 : index
      %c0_25 = arith.constant 0 : index
      %37 = vector.load %arg3[%c0_24, %c0_25] : memref<8x128xf32, #tpu.memory_space<vmem>>, vector<8x128xf32>
      %c0_26 = arith.constant 0 : index
      %c0_27 = arith.constant 0 : index
      %38 = vector.load %arg6[%c0_26, %c0_27] : memref<8x128xf32, #tpu.memory_space<vmem>>, vector<8x128xf32>
      tpu.vector_store %arg6[%c0_26, %c0_27], %37 {strides = array<i32>} : memref<8x128xf32, #tpu.memory_space<vmem>>, vector<8x128xf32>,
      %cst_28 = arith.constant 0.000000e+00 : f32
      %39 = vector.broadcast %cst_28 : f32 to vector<8x128xf32>
      %c0_29 = arith.constant 0 : index
      %c0_30 = arith.constant 0 : index
      %40 = vector.load %arg7[%c0_29, %c0_30] : memref<8x128xf32, #tpu.memory_space<vmem>>, vector<8x128xf32>
      tpu.vector_store %arg7[%c0_29, %c0_30], %39 {strides = array<i32>} : memref<8x128xf32, #tpu.memory_space<vmem>>, vector<8x128xf32>,
    } else {
    }
    %c0 = arith.constant 0 : index
    %c0_1 = arith.constant 0 : index
    %3 = vector.load %arg6[%c0, %c0_1] : memref<8x128xf32, #tpu.memory_space<vmem>>, vector<8x128xf32>
    %c0_2 = arith.constant 0 : index
    %c0_3 = arith.constant 0 : index
    %c0_4 = arith.constant 0 : index
    %4 = vector.load %arg1[%c0_2, %c0_3, %c0_4] : memref<1x128x128xf32, #tpu.memory_space<vmem>>, vector<1x128x128xf32>
    %5 = vector.shape_cast %4 : vector<1x128x128xf32> to vector<128x128xf32>
    %c0_5 = arith.constant 0 : index
    %c0_6 = arith.constant 0 : index
    %c0_7 = arith.constant 0 : index
    %6 = vector.load %arg2[%c0_5, %c0_6, %c0_7] : memref<1x128x128xf32, #tpu.memory_space<vmem>>, vector<1x128x128xf32>
    %7 = vector.shape_cast %6 : vector<1x128x128xf32> to vector<128x128xf32>
    %cst = arith.constant dense<0.000000e+00> : vector<8x128xf32>
    %8 = tpu.matmul %3, %5, %cst {dimension_numbers = #tpu.dot_dimension_numbers<[1], [0], [0], [1], [0, 0, 1, 1], [], []>} : vector<8x128xf32>, vector<128x128xf32>, vector<8x128xf32> -> vector<8x128xf32>
    %cst_8 = arith.constant dense<0.000000e+00> : vector<8x128xf32>
    %9 = tpu.matmul %3, %7, %cst_8 {dimension_numbers = #tpu.dot_dimension_numbers<[1], [0], [0], [1], [0, 0, 1, 1], [], []>} : vector<8x128xf32>, vector<128x128xf32>, vector<8x128xf32> -> vector<8x128xf32>
    %c4_i32 = arith.constant 4 : i32
    %10 = tpu.dynamic_rotate %9 by %c4_i32 dim 0 : vector<8x128xf32>, i32 -> vector<8x128xf32>
    %11 = tpu.iota {dimensions = array<i32: 0>} : vector<8x1xi32>
    %c0_i32_9 = arith.constant 0 : i32
    %12 = vector.broadcast %c0_i32_9 : i32 to vector<8x1xi32>
    %13 = arith.cmpi eq, %11, %12 : vector<8x1xi32>
    %cst_10 = arith.constant -1.000000e+00 : f32
    %cst_11 = arith.constant 1.000000e+00 : f32
    %14 = vector.broadcast %cst_10 : f32 to vector<8x1xf32>
    %15 = vector.broadcast %cst_11 : f32 to vector<8x1xf32>
    %16 = arith.select %13, %14, %15 : vector<8x1xi1>, vector<8x1xf32>
    %17 = vector.broadcast %16 : vector<8x1xf32> to vector<8x128xf32>
    %18 = arith.mulf %17, %10 : vector<8x128xf32>
    %19 = arith.addf %8, %18 : vector<8x128xf32>
    %c0_12 = arith.constant 0 : index
    %c0_13 = arith.constant 0 : index
    %20 = vector.load %arg6[%c0_12, %c0_13] : memref<8x128xf32, #tpu.memory_space<vmem>>, vector<8x128xf32>
    tpu.vector_store %arg6[%c0_12, %c0_13], %19 {strides = array<i32>} : memref<8x128xf32, #tpu.memory_space<vmem>>, vector<8x128xf32>,
    %21 = arith.mulf %19, %19 : vector<8x128xf32>
    %cst_14 = arith.constant dense<0.000000e+00> : vector<128xf32>
    %22 = vector.multi_reduction <add>, %21, %cst_14 [0] : vector<8x128xf32> to vector<128xf32>
    %23 = vector.shape_cast %22 : vector<128xf32> to vector<1x128xf32>
    %c0_15 = arith.constant 0 : index
    %c0_16 = arith.constant 0 : index
    %c0_17 = arith.constant 0 : index
    %24 = vector.load %arg4[%c0_15, %c0_16, %c0_17] : memref<1x8x128xf32, #tpu.memory_space<vmem>>, vector<1x8x128xf32>
    %25 = vector.shape_cast %24 : vector<1x8x128xf32> to vector<8x128xf32>
    %26 = vector.broadcast %23 : vector<1x128xf32> to vector<8x128xf32>
    %27 = arith.mulf %26, %25 : vector<8x128xf32>
    %cst_18 = arith.constant dense<0.000000e+00> : vector<8xf32>
    %28 = vector.multi_reduction <add>, %27, %cst_18 [1] : vector<8x128xf32> to vector<8xf32>
    %29 = vector.shape_cast %28 : vector<8xf32> to vector<8x1xf32>
    %c0_19 = arith.constant 0 : index
    %c0_20 = arith.constant 0 : index
    %30 = vector.load %arg7[%c0_19, %c0_20] : memref<8x128xf32, #tpu.memory_space<vmem>>, vector<8x128xf32>
    %31 = vector.broadcast %29 : vector<8x1xf32> to vector<8x128xf32>
    %32 = arith.addf %30, %31 : vector<8x128xf32>
    %c0_21 = arith.constant 0 : index
    %c0_22 = arith.constant 0 : index
    %33 = vector.load %arg7[%c0_21, %c0_22] : memref<8x128xf32, #tpu.memory_space<vmem>>, vector<8x128xf32>
    tpu.vector_store %arg7[%c0_21, %c0_22], %32 {strides = array<i32>} : memref<8x128xf32, #tpu.memory_space<vmem>>, vector<8x128xf32>,
    %c2_i32 = arith.constant 2 : i32
    %34 = arith.cmpi eq, %arg0, %c2_i32 : i32
    %35 = arith.extui %34 : i1 to i32
    %c0_i32_23 = arith.constant 0 : i32
    %36 = arith.cmpi ne, %35, %c0_i32_23 : i32
    scf.if %36 {
      %c0_24 = arith.constant 0 : index
      %c0_25 = arith.constant 0 : index
      %37 = vector.load %arg7[%c0_24, %c0_25] : memref<8x128xf32, #tpu.memory_space<vmem>>, vector<8x128xf32>
      %c0_26 = arith.constant 0 : index
      %c0_27 = arith.constant 0 : index
      %38 = vector.load %arg5[%c0_26, %c0_27] : memref<8x128xf32, #tpu.memory_space<vmem>>, vector<8x128xf32>
      tpu.vector_store %arg5[%c0_26, %c0_27], %37 {strides = array<i32>} : memref<8x128xf32, #tpu.memory_space<vmem>>, vector<8x128xf32>,
    } else {
    }
    return
  }
  func.func @transform_0(%arg0: i32) -> (i32, i32, i32) {
    %c0_i32 = arith.constant 0 : i32
    %c0_i32_0 = arith.constant 0 : i32
    %c0_i32_1 = arith.constant 0 : i32
    return %arg0, %c0_i32, %c0_i32_0 : i32, i32, i32
  }
  func.func @transform_1(%arg0: i32) -> (i32, i32, i32) {
    %c0_i32 = arith.constant 0 : i32
    %c0_i32_0 = arith.constant 0 : i32
    %c0_i32_1 = arith.constant 0 : i32
    return %arg0, %c0_i32, %c0_i32_0 : i32, i32, i32
  }
  func.func @transform_2(%arg0: i32) -> (i32, i32) {
    %c0_i32 = arith.constant 0 : i32
    %c0_i32_0 = arith.constant 0 : i32
    %c0_i32_1 = arith.constant 0 : i32
    return %c0_i32, %c0_i32_0 : i32, i32
  }
  func.func @transform_3(%arg0: i32) -> (i32, i32, i32) {
    %c0_i32 = arith.constant 0 : i32
    %c0_i32_0 = arith.constant 0 : i32
    %c0_i32_1 = arith.constant 0 : i32
    return %arg0, %c0_i32, %c0_i32_0 : i32, i32, i32
  }
  func.func @transform_4(%arg0: i32) -> (i32, i32) {
    %c0_i32 = arith.constant 0 : i32
    %c0_i32_0 = arith.constant 0 : i32
    %c0_i32_1 = arith.constant 0 : i32
    return %c0_i32, %c0_i32_0 : i32, i32
  }
}

</mosaic_0001>

<bundles_post_ra>
// kernel: tpu_custom_call.1
= control target key start
LH: loop header
LB: loop body
LE: loop exit
PB: predicated region body
PF: predicated region fallthrough
CT: control target
= control target key end

     0   :  { %9 = vsyncpa [#allocation5], 0  ;;  %s1330_s0 = inlined_call_operand.hbm [shape: f32[3,128,128], index: 0, kind: input, shape index: {}]   ;;  %s1331_s1 = inlined_call_operand.hbm [shape: f32[3,128,128], index: 1, kind: input, shape index: {}]   ;;  %s1332_s2 = inlined_call_operand.hbm [shape: f32[8,128], index: 2, kind: input, shape index: {}]   ;;  %s1333_s3 = inlined_call_operand.hbm [shape: f32[3,8,128], index: 3, kind: input, shape index: {}]   ;;  %s1334_s4 = inlined_call_operand.hbm [shape: f32[8,128], index: 4, kind: output, shape index: {}]  }
   0x1   :  { %11 = vsyncpa [#allocation5 + $0x1], 0 }
   0x2   :  { %12 = vsyncpa [#allocation8], 0 }
   0x3   :  { %14 = vsyncpa [#allocation8 + $0x1], 0 }
   0x4   :  { %15 = vsyncpa [#allocation11], 0 }
   0x5   :  { %17 = vsyncpa [#allocation11 + $0x1], 0 }
   0x6   :  { %18 = vsyncpa [#allocation6], 0  ;;  %s1036_s15 = smov 0   ;;  %s1038_s16 = smov 0  }
   0x7   :  { %s1040_s17 = smov 0   ;;  %s1042_s18 = smov 0  }
   0x8 LB: > { %s1055_s19 = sadd.s32 4294967295, %s998_s18   ;;  %s1058_s20 = sadd.s32 1, %s998_s18   ;;  %s998_s18 = sphi %s1042_s18, %s1351_s18   ;;  %s994_s17 = sphi %s1040_s17, %s1350_s17   ;;  %s990_s16 = sphi %s1038_s16, %s1349_s16   ;;  %s986_s15 = sphi %s1036_s15, %s1348_s15  }
   0x9   : > { %s28_s21 = ssub.s32 %s998_s18, %s1058_s20  ;;  %s31_s22 = sadd.s32 1, %s994_s17 }
   0xa   : > { %p29_p0 = scmp.eq.s32.totalorder %s28_s21, 0  ;;  %p38_p1 = scmp.ne.s32.totalorder %s994_s17, %s990_s16 }
   0xb   : > { %p39_p2 = scmp.eq.s32.totalorder %s998_s18, 0  ;;  %p44_p3 = scmp.ne.s32.totalorder %s990_s16, %s986_s15 }
   0xc   : > { %s1068_s23 = scalar_select %p29_p0, %s994_s17, %s31_s22  }
   0xd   : > { %p1070_p4 = por %p39_p2, %p38_p1  ;;  %p1337_p5 = scmp.eq.s32.totalorder %s1055_s19, 0 }
   0xe   : > { %p613_p6 = scmp.ge.s32.totalorder %s998_s18, 1  ;;  %p149_p7 = scmp.lt.s32.totalorder %s998_s18, 4 }
   0xf   : > { %p1079_p8 = por %p1337_p5, %p44_p3  ;;  %s1000_s27 = smov [#allocation9]  }
  0x10   : > { %p1084_p10 = pnand %p613_p6, %p149_p7  ;;  %s162_s28 = sshll.u32 %s1000_s27, 4  ;;  %s163_s28 = int_to_ptr.vmem [resolvable:$true] %s162_s28 }
  0x11   : > { %s1339_s25 = scalar_select %p1079_p8, 1, 0 }
  0x12   : > { %s1340_s26 = scalar_select %p1084_p10, 1, 0 }
  0x13   : > { %p755_p11 = pneg %p1084_p10  ;;  %p770_p12 = scmp.lt.s32.totalorder %s998_s18, 3 }
  0x14   : > { %s1092_s29 = sand.u32 1, %s994_s17   ;;  %s825_s6 = scalar_lea.vmem %s163_s28, 128 }
  0x15   : > { %p756_p13 = pnand %p755_p11, %p1337_p5  ;;  %p1098_p0 = pnand %p770_p12, %p1070_p4 }
  0x16   : > { %s616_s5 = sshll.u32 %s1092_s29, 7  ;;  %p826_p2 = scmp.ne.s32.totalorder %s163_s28, %s825_s6 }
  0x17   : > { %p816_p1 = pneg %p756_p13  ;;  %p833_p7 = scmp.lt.s32.totalorder %s163_s28, %s163_s28 }
  0x18   : > { %p834_p9 = scmp.lt.s32.totalorder %s825_s6, %s825_s6 }
  0x19   : > { %p828_p3 = pnand %p826_p2, %p816_p1 }
  0x1a   : > { %p835_p8 = por %p834_p9, %p833_p7 }
  0x1b   : > { %p829_p6 = pneg %p828_p3 }
  0x1d   : > { %p836_p10 = pnand %p835_p8, %p829_p6 }
  0x1f   : > { %839 = shalt.err (!%p836_p10)
}
  0x20   : > { %758 = dma.hbm_to_vmem [thread:$0]  (!%p756_p13), %s1332_s2, 128, %s163_s28, [#allocation8]  }
  0x21   : > { %s635_s9 = sshll.u32 %s998_s18, 11  ;;  %s177_s13 = scalar_lea.vmem [#allocation4], %s616_s5 }
  0x22   : > { %s1112_s12 = scalar_lea.hbm %s1330_s0, %s635_s9  ;;  %s184_s14 = sshll.u32 %s177_s13, 4  ;;  %s1116_s14 = int_to_ptr.vmem [resolvable:$true] %s184_s14 }
  0x23   : > { %s174_s15 = scalar_lea.sflag [#allocation5], %s1092_s29  ;;  %s840_s21 = scalar_lea.hbm %s1112_s12, 2048 }
  0x24   : > { %p841_p4 = scmp.ne.s32.totalorder %s1112_s12, %s840_s21  ;;  %p1123_p8 = pneg %p1098_p0 }
  0x25   : > { %s845_s28 = scalar_lea.hbm %s1330_s0, 6144  ;;  %p846_p11 = scmp.lt.s32.totalorder %s1112_s12, %s1330_s0 }
  0x26   : > { %p843_p9 = pnand %p1123_p8, %p841_p4  ;;  %p847_p12 = scmp.lt.s32.totalorder %s845_s28, %s840_s21 }
  0x28   : > { %p844_p10 = pneg %p843_p9  ;;  %p848_p13 = por %p847_p12, %p846_p11 }
  0x2a   : > { %p849_p1 = pnand %p848_p13, %p844_p10 }
  0x2c   : > { %852 = shalt.err (!%p849_p1)
}
  0x2d   : > { %s853_s8 = scalar_lea.vmem %s1116_s14, 2048  ;;  %s1001_s10 = smov [#allocation4]  }
  0x2e   : > { %p854_p2 = scmp.ne.s32.totalorder %s1116_s14, %s853_s8  ;;  %s858_s11 = sshll.u32 %s1001_s10, 4  ;;  %s859_s11 = int_to_ptr.vmem [resolvable:$false] %s858_s11 }
  0x2f   : > { %s860_s13 = scalar_lea.vmem %s859_s11, 4096  ;;  %p861_p7 = scmp.lt.s32.totalorder %s1116_s14, %s859_s11 }
  0x30   : > { %p856_p3 = pnand %p854_p2, %p1123_p8  ;;  %p862_p4 = scmp.lt.s32.totalorder %s860_s13, %s853_s8 }
  0x32   : > { %p857_p6 = pneg %p856_p3  ;;  %p863_p9 = por %p862_p4, %p861_p7 }
  0x34   : > { %p864_p5 = pnand %p863_p9, %p857_p6 }
  0x36   : > { %867 = shalt.err (!%p864_p5)
}
  0x37   : > { %s1002_s21 = smov 128   ;;  %s1003_s24 = smov 8  }
  0x38   : > { %762 = dma.hbm_to_vmem [thread:$0]  (!%p1098_p0), %s1112_s12, 2048, %s1116_s14, %s174_s15, %s1002_s21, %s1002_s21, %s1003_s24  }
  0x39   : > { %s1155_s6 = scalar_lea.hbm %s1331_s1, %s635_s9  ;;  %s198_s7 = scalar_lea.vmem [#allocation7], %s616_s5 }
  0x3a   : > { %s205_s8 = sshll.u32 %s198_s7, 4  ;;  %s194_s10 = sand.u32 1, %s998_s18   ;;  %s1159_s8 = int_to_ptr.vmem [resolvable:$true] %s205_s8 }
  0x3b   : > { %s195_s11 = scalar_lea.sflag [#allocation8], %s194_s10  ;;  %s868_s13 = scalar_lea.hbm %s1155_s6, 2048 }
  0x3c   : > { %p869_p5 = scmp.ne.s32.totalorder %s1155_s6, %s868_s13  ;;  %s873_s9 = scalar_lea.hbm %s1331_s1, 6144 }
  0x3d   : > { %p874_p12 = scmp.lt.s32.totalorder %s1155_s6, %s1331_s1  ;;  %p875_p13 = scmp.lt.s32.totalorder %s873_s9, %s868_s13 }
  0x3e   : > { %p871_p10 = pnand %p869_p5, %p1123_p8 }
  0x3f   : > { %p876_p1 = por %p875_p13, %p874_p12 }
  0x40   : > { %p872_p11 = pneg %p871_p10 }
  0x42   : > { %p877_p2 = pnand %p876_p1, %p872_p11 }
  0x44   : > { %880 = shalt.err (!%p877_p2)
}
  0x45   : > { %s881_s5 = scalar_lea.vmem %s1159_s8, 2048  ;;  %s1004_s28 = smov [#allocation7]  }
  0x46   : > { %p882_p3 = scmp.ne.s32.totalorder %s1159_s8, %s881_s5  ;;  %s886_s7 = sshll.u32 %s1004_s28, 4  ;;  %s887_s7 = int_to_ptr.vmem [resolvable:$false] %s886_s7 }
  0x47   : > { %s888_s10 = scalar_lea.vmem %s887_s7, 4096  ;;  %p889_p4 = scmp.lt.s32.totalorder %s1159_s8, %s887_s7 }
  0x48   : > { %p884_p6 = pnand %p882_p3, %p1123_p8  ;;  %p890_p9 = scmp.lt.s32.totalorder %s888_s10, %s881_s5 }
  0x4a   : > { %p885_p7 = pneg %p884_p6  ;;  %p891_p5 = por %p890_p9, %p889_p4 }
  0x4c   : > { %p892_p10 = pnand %p891_p5, %p885_p7 }
  0x4e   : > { %895 = shalt.err (!%p892_p10)
}
  0x4f   : > { %765 = dma.hbm_to_vmem [thread:$0]  (!%p1098_p0), %s1155_s6, 2048, %s1159_s8, %s195_s11, %s1002_s21, %s1002_s21, %s1003_s24  }
  0x50   : > { %s622_s13 = sshll.u32 %s1092_s29, 3  ;;  %s623_s12 = sshll.u32 %s998_s18, 7 }
  0x51   : > { %s1190_s15 = scalar_lea.hbm %s1333_s3, %s623_s12  ;;  %s219_s27 = scalar_lea.vmem [#allocation10], %s622_s13 }
  0x52   : > { %s226_s5 = sshll.u32 %s219_s27, 4  ;;  %s216_s28 = scalar_lea.sflag [#allocation11], %s1092_s29  ;;  %s227_s5 = int_to_ptr.vmem [resolvable:$true] %s226_s5 }
  0x53   : > { %s896_s7 = scalar_lea.hbm %s1190_s15, 128  ;;  %s901_s18 = scalar_lea.hbm %s1333_s3, 384 }
  0x54   : > { %p897_p11 = scmp.ne.s32.totalorder %s1190_s15, %s896_s7  ;;  %p902_p1 = scmp.lt.s32.totalorder %s1190_s15, %s1333_s3 }
  0x55   : > { %p903_p2 = scmp.lt.s32.totalorder %s901_s18, %s896_s7 }
  0x56   : > { %p899_p12 = pnand %p897_p11, %p1123_p8 }
  0x57   : > { %p904_p3 = por %p903_p2, %p902_p1 }
  0x58   : > { %p900_p13 = pneg %p899_p12 }
  0x5a   : > { %p905_p6 = pnand %p904_p3, %p900_p13 }
  0x5c   : > { %908 = shalt.err (!%p905_p6)
}
  0x5d   : > { %s909_s11 = scalar_lea.vmem %s227_s5, 128  ;;  %s1005_s29 = smov [#allocation10]  }
  0x5e   : > { %p910_p7 = scmp.ne.s32.totalorder %s227_s5, %s909_s11  ;;  %s914_s10 = sshll.u32 %s1005_s29, 4  ;;  %s915_s10 = int_to_ptr.vmem [resolvable:$false] %s914_s10 }
  0x5f   : > { %s916_s13 = scalar_lea.vmem %s915_s10, 256  ;;  %p917_p5 = scmp.lt.s32.totalorder %s227_s5, %s915_s10 }
  0x60   : > { %p912_p4 = pnand %p910_p7, %p1123_p8  ;;  %p918_p10 = scmp.lt.s32.totalorder %s916_s13, %s909_s11 }
  0x62   : > { %p913_p9 = pneg %p912_p4  ;;  %p919_p11 = por %p918_p10, %p917_p5 }
  0x64   : > { %p920_p12 = pnand %p919_p11, %p913_p9 }
  0x66   : > { %923 = shalt.err (!%p920_p12)
}
  0x67   : > { %768 = dma.hbm_to_vmem [thread:$0]  (!%p1098_p0), %s1190_s15, 128, %s227_s5, %s216_s28  }
  0x68   : > { %p1343_p13 = scmp.ne.s32.totalorder %s1340_s26, 0 }
  0x69   : > { %s237_s22 = sand.u32 (!%p1343_p13), 1, %s990_s16   ;;  %p1344_p8 = scmp.ne.s32.totalorder (!%p1343_p13), %s1339_s25, 0 }
  0x6a   : > { %235 = sbr.rel (%p1343_p13) target bundleno = 542 (0x21e), region = 36  ;;  %s625_s12 = sshll.u32 (!%p1343_p13), %s237_s22, 7 }
  0x6b   : > { %s238_s14 = scalar_lea.sflag (!%p1343_p13), [#allocation5], %s237_s22  ;;  %s1212_s9 = scalar_lea.vmem (!%p1343_p13), [#allocation4], %s625_s12 }
  0x6f   : > { %965 = dma.done.wait (%p1344_p8), %s238_s14, 2048  }
  0x70   : > { %967 = vsyncadd (%p1344_p8), %s238_s14, 4294965248  ;;  %s246_s30 = sand.u32 1, %s1055_s19   ;;  %s1219_s15 = scalar_lea.vmem [#allocation7], %s625_s12 }
  0x71   : > { %s247_s27 = scalar_lea.sflag [#allocation8], %s246_s30 }
  0x72   : > { %969 = dma.done.wait (%p1344_p8), %s247_s27, 2048  }
  0x73   : > { %971 = vsyncadd (%p1344_p8), %s247_s27, 4294965248  ;;  %p1345_p0 = scmp.eq.s32.totalorder %s1055_s19, 0 }
  0x75   : > { %973 = dma.done.wait (%p1345_p0), [#allocation8], 128   ;;  %p1346_p1 = pmov %p1345_p0 }
  0x76   : > { %s628_s26 = sshll.u32 %s237_s22, 3  ;;  %s260_s5 = scalar_lea.sflag [#allocation11], %s237_s22 }
  0x77   : > { %975 = vsyncadd (%p1346_p1), [#allocation8], 4294967168  ;;  %s1229_s28 = scalar_lea.vmem [#allocation10], %s628_s26 }
  0x78   : > { %977 = dma.done.wait (%p1344_p8), %s260_s5, 128  }
  0x79   : > { %979 = vsyncadd (%p1344_p8), %s260_s5, 4294967168  ;;  %p1347_p2 = scmp.ne.s32.totalorder %s1055_s19, 0 }
  0x7b   : > { %296 = sbr.rel (%p1347_p2) target bundleno = 130 (0x82), region = 56 }
  0x80   : > { %v297_v0 = vld [vmem:[#allocation9] sm:$0xff]  ;;  %v1006_v1 = vmov 0.0  }
  0x81   : > { %298 = vst [vmem:[#allocation2] sm:$0xff] %v297_v0  ;;  %299 = vst [vmem:[#allocation3] sm:$0xff] %v1006_v1 }
  0x82 PF: > { %v332_v2 = vld [vmem:[%s1219_s15 + $0x78] sm:$0xff]  ;;  %v1007_v4 = vmov 0.0   ;;  %v331_v5 = vld [vmem:[%s1219_s15 + $0x70] sm:$0xff]  ;;  %v330_v7 = vld [vmem:[%s1219_s15 + $0x68] sm:$0xff]  ;;  %vm1008_vm0 = vmmov 0   ;;  %v404_v36 = vlaneseq  ;;  %v1009_v39 = vmov 1.0  }
  0x83   : > { %v316_v3 = vld [vmem:[%s1212_s9 + $0x78] sm:$0xff]  ;;  %671 = vmatprep.subr.mxu0 %v1007_v4  ;;  %706 = vmatprep.subr.mxu1 %v1007_v4  ;;  %v315_v6 = vld [vmem:[%s1212_s9 + $0x70] sm:$0xff]  ;;  %v314_v8 = vld [vmem:[%s1212_s9 + $0x68] sm:$0xff]  ;;  %p630_p3 = scmp.ne.s32.totalorder %s1055_s19, 2 }
  0x84   : > { %672 = vmatpush3.msra.mxu0 %v332_v2  ;;  %707 = vmatpush3.msra.mxu1 %v316_v3  ;;  %v329_v9 = vld [vmem:[%s1219_s15 + $0x60] sm:$0xff]  ;;  %v328_v11 = vld [vmem:[%s1219_s15 + $0x58] sm:$0xff]  ;;  %v327_v13 = vld [vmem:[%s1219_s15 + $0x50] sm:$0xff]  ;;  %v405_v37 = vshrl.u32 %v404_v36, 7 }
  0x85   : > { %673 = vmatprep.subr.mxu0 %v1007_v4  ;;  %708 = vmatprep.subr.mxu1 %v1007_v4  ;;  %v313_v10 = vld [vmem:[%s1212_s9 + $0x60] sm:$0xff]  ;;  %v312_v12 = vld [vmem:[%s1212_s9 + $0x58] sm:$0xff]  ;;  %v311_v14 = vld [vmem:[%s1212_s9 + $0x50] sm:$0xff] }
  0x86   : > { %674 = vmatpush3.msra.mxu0 %v331_v5  ;;  %709 = vmatpush3.msra.mxu1 %v315_v6  ;;  %v326_v15 = vld [vmem:[%s1219_s15 + $0x48] sm:$0xff]  ;;  %v325_v17 = vld [vmem:[%s1219_s15 + $0x40] sm:$0xff]  ;;  %v324_v19 = vld [vmem:[%s1219_s15 + $0x38] sm:$0xff]  ;;  %vm406_vm1 = vcmp.eq.s32.totalorder %v405_v37, 0 }
  0x87   : > { %675 = vmatprep.subr.mxu0 %v1007_v4  ;;  %710 = vmatprep.subr.mxu1 %v1007_v4  ;;  %v310_v16 = vld [vmem:[%s1212_s9 + $0x48] sm:$0xff]  ;;  %v309_v18 = vld [vmem:[%s1212_s9 + $0x40] sm:$0xff]  ;;  %v308_v20 = vld [vmem:[%s1212_s9 + $0x38] sm:$0xff]  ;;  %v407_v40 = vsel %vm406_vm1, -1.0, %v1009_v39 }
  0x88   : > { %676 = vmatpush3.msra.mxu0 %v330_v7  ;;  %711 = vmatpush3.msra.mxu1 %v314_v8  ;;  %v323_v21 = vld [vmem:[%s1219_s15 + $0x30] sm:$0xff]  ;;  %v322_v23 = vld [vmem:[%s1219_s15 + $0x28] sm:$0xff]  ;;  %v321_v25 = vld [vmem:[%s1219_s15 + $0x20] sm:$0xff] }
  0x89   : > { %677 = vmatprep.subr.mxu0 %v1007_v4  ;;  %712 = vmatprep.subr.mxu1 %v1007_v4  ;;  %v307_v22 = vld [vmem:[%s1212_s9 + $0x30] sm:$0xff]  ;;  %v306_v24 = vld [vmem:[%s1212_s9 + $0x28] sm:$0xff]  ;;  %v305_v26 = vld [vmem:[%s1212_s9 + $0x20] sm:$0xff] }
  0x8a   : > { %678 = vmatpush3.msra.mxu0 %v329_v9  ;;  %713 = vmatpush3.msra.mxu1 %v313_v10  ;;  %v320_v27 = vld [vmem:[%s1219_s15 + $0x18] sm:$0xff]  ;;  %v319_v29 = vld [vmem:[%s1219_s15 + $0x10] sm:$0xff]  ;;  %v318_v31 = vld [vmem:[%s1219_s15 + $0x8] sm:$0xff] }
  0x8b   : > { %679 = vmatprep.subr.mxu0 %v1007_v4  ;;  %714 = vmatprep.subr.mxu1 %v1007_v4  ;;  %v304_v28 = vld [vmem:[%s1212_s9 + $0x18] sm:$0xff]  ;;  %v303_v30 = vld [vmem:[%s1212_s9 + $0x10] sm:$0xff]  ;;  %v302_v32 = vld [vmem:[%s1212_s9 + $0x8] sm:$0xff] }
  0x8c   : > { %680 = vmatpush3.msra.mxu0 %v328_v11  ;;  %715 = vmatpush3.msra.mxu1 %v312_v12  ;;  %v317_v33 = vld [vmem:[%s1219_s15] sm:$0xff]  ;;  %v300_v34 = vld [vmem:[#allocation2] sm:$0xff]  ;;  %v491_v56 = vld [vmem:[#allocation3] sm:$0xff] }
  0x8d   : > { %681 = vmatprep.subr.mxu0 %v1007_v4  ;;  %716 = vmatprep.subr.mxu1 %v1007_v4  ;;  %v301_v35 = vld [vmem:[%s1212_s9] sm:$0xff]  ;;  %v487_v53 = vld [vmem:[%s1229_s28] sm:$0xff] }
  0x8e   : > { %682 = vmatpush3.msra.mxu0 %v327_v13  ;;  %717 = vmatpush3.msra.mxu1 %v311_v14 }
  0x8f   : > { %683 = vmatprep.subr.mxu0 %v1007_v4  ;;  %718 = vmatprep.subr.mxu1 %v1007_v4 }
  0x90   : > { %684 = vmatpush3.msra.mxu0 %v326_v15  ;;  %719 = vmatpush3.msra.mxu1 %v310_v16 }
  0x91   : > { %685 = vmatprep.subr.mxu0 %v1007_v4  ;;  %720 = vmatprep.subr.mxu1 %v1007_v4 }
  0x92   : > { %686 = vmatpush3.msra.mxu0 %v325_v17  ;;  %721 = vmatpush3.msra.mxu1 %v309_v18 }
  0x93   : > { %687 = vmatprep.subr.mxu0 %v1007_v4  ;;  %722 = vmatprep.subr.mxu1 %v1007_v4 }
  0x94   : > { %688 = vmatpush3.msra.mxu0 %v324_v19  ;;  %723 = vmatpush3.msra.mxu1 %v308_v20 }
  0x95   : > { %689 = vmatprep.subr.mxu0 %v1007_v4  ;;  %724 = vmatprep.subr.mxu1 %v1007_v4 }
  0x96   : > { %690 = vmatpush3.msra.mxu0 %v323_v21  ;;  %725 = vmatpush3.msra.mxu1 %v307_v22 }
  0x97   : > { %691 = vmatprep.subr.mxu0 %v1007_v4  ;;  %726 = vmatprep.subr.mxu1 %v1007_v4 }
  0x98   : > { %692 = vmatpush3.msra.mxu0 %v322_v23  ;;  %727 = vmatpush3.msra.mxu1 %v306_v24 }
  0x99   : > { %693 = vmatprep.subr.mxu0 %v1007_v4  ;;  %728 = vmatprep.subr.mxu1 %v1007_v4 }
  0x9a   : > { %694 = vmatpush3.msra.mxu0 %v321_v25  ;;  %729 = vmatpush3.msra.mxu1 %v305_v26 }
  0x9b   : > { %695 = vmatprep.subr.mxu0 %v1007_v4  ;;  %730 = vmatprep.subr.mxu1 %v1007_v4 }
  0x9c   : > { %696 = vmatpush3.msra.mxu0 %v320_v27  ;;  %731 = vmatpush3.msra.mxu1 %v304_v28 }
  0x9d   : > { %697 = vmatprep.subr.mxu0 %v1007_v4  ;;  %732 = vmatprep.subr.mxu1 %v1007_v4 }
  0x9e   : > { %698 = vmatpush3.msra.mxu0 %v319_v29  ;;  %733 = vmatpush3.msra.mxu1 %v303_v30 }
  0x9f   : > { %699 = vmatprep.subr.mxu0 %v1007_v4  ;;  %734 = vmatprep.subr.mxu1 %v1007_v4 }
  0xa0   : > { %700 = vmatpush3.msra.mxu0 %v318_v31  ;;  %703 = vmatprep.mubr.msk.f32.mxu0 %vm1008_vm0, %v1007_v4 }
  0xa1   : > { %701 = vmatprep.subr.mxu0 %v1007_v4  ;;  %735 = vmatpush3.msra.mxu1 %v302_v32 }
  0xa2   : > { %702 = vmatpush3.msra.mxu0 %v317_v33  ;;  %736 = vmatprep.subr.mxu1 %v1007_v4 }
  0xa3   : > { %704 = vmatmul.mubr.f32.vlgmr.msra.gmra.mxu0 %v300_v34  ;;  %737 = vmatpush3.msra.mxu1 %v301_v35 }
  0xa4   : > { %738 = vmatprep.mubr.msk.f32.mxu1 %vm1008_vm0, %v1007_v4 }
  0xa5   : > { %739 = vmatmul.mubr.f32.vlgmr.msra.gmra.mxu1 %v300_v34 }
 0x163   : > { %v399_v38 = vpop.f32.mrf.mxu0 }
 0x164   : > { %v403_v41 = vrot.slane %v399_v38, 4 }
 0x165   : > { %v705_v42 = vpop.f32.mrf.mxu0  ;;  %v475_v43 = vpop.f32.mrf.mxu1 }
 0x166   : > { %v408_v44 = vmul.f32 %v407_v40, %v403_v41 }
 0x167   : > { %v740_v45 = vpop.f32.mrf.mxu1 }
 0x168   : > { %v476_v46 = vadd.f32 %v475_v43, %v408_v44 }
 0x16a   : > { %479 = vst [vmem:[#allocation2] sm:$0xff] %v476_v46  ;;  %v480_v47 = vmul.f32 %v476_v46, %v476_v46 }
 0x16c   : > { %v481_v48 = vrot.slane %v480_v47, 4 }
 0x16e   : > { %v482_v49 = vadd.f32 %v481_v48, %v480_v47 }
 0x170   : > { %v483_v50 = vrot.slane %v482_v49, 2 }
 0x172   : > { %v484_v51 = vadd.f32 %v483_v50, %v482_v49 }
 0x174   : > { %v485_v52 = vrot.slane %v484_v51, 1 }
 0x176   : > { %v486_v54 = vadd.f32 %v485_v52, %v484_v51 }
 0x178   : > { %v488_v55 = vmul.f32 %v487_v53, %v486_v54 }
 0x17a   : > { %489 = vadd.xlane.f32.xlu0 %v488_v55 }
 0x202   : > { %497 = sbr.rel (%p630_p3) target bundleno = 527 (0x20f), region = 60 }
 0x203   : > { %v490_v57 = vpop.xlane.xlu0 %489 }
 0x204   : > { %v492_v58 = vadd.f32 %v491_v56, %v490_v57 }
 0x206   : > { %493 = vst [vmem:[#allocation3] sm:$0xff] %v492_v58 }
 0x20d   : > { %v498_v59 = vld [vmem:[#allocation3] sm:$0xff] }
 0x20e   : > { %499 = vst [vmem:[#allocation12] sm:$0xff] %v498_v59 }
 0x20f PF: > { %p772_p6 = scmp.eq.s32.totalorder %s1055_s19, 2  ;;  %s1010_s25 = smov [#allocation12]  }
 0x210   : > { %s507_s7 = sshll.u32 %s1010_s25, 4  ;;  %s508_s7 = int_to_ptr.vmem [resolvable:$true] %s507_s7 }
 0x211   : > { %s924_s21 = scalar_lea.vmem %s508_s7, 128  ;;  %p931_p5 = scmp.lt.s32.totalorder %s508_s7, %s508_s7 }
 0x212   : > { %p925_p7 = scmp.ne.s32.totalorder %s508_s7, %s924_s21  ;;  %p932_p10 = scmp.lt.s32.totalorder %s924_s21, %s924_s21 }
 0x214   : > { %p926_p4 = pnand %p925_p7, %p772_p6  ;;  %p933_p11 = por %p932_p10, %p931_p5 }
 0x216   : > { %p927_p9 = pneg %p926_p4 }
 0x218   : > { %p934_p12 = pnand %p933_p11, %p927_p9 }
 0x21a   : > { %937 = shalt.err (!%p934_p12)
}
 0x21b   : > { %752 = dma.vmem_to_hbm [thread:$0]  (%p772_p6), %s508_s7, 128, %s1334_s4, [#allocation6]  }
 0x21c   : > { %981 = dma.done.wait (%p772_p6), [#allocation6], 128  }
 0x21d   : > { %983 = vsyncadd (%p772_p6), [#allocation6], 4294967168 }
 0x21e PF: > { %p21_p13 = scmp.ge.s32.totalorder %s1058_s20, 5   ;;  %s1348_s15 = smov %s990_s16 }
 0x21f   : > { %s1349_s16 = smov %s994_s17  ;;  %s1350_s17 = smov %s1068_s23 }
 0x220   : > { %s1351_s18 = smov %s1058_s20  ;;  %23 = sbr.rel (!%p21_p13) target bundleno = 8 (0x8), region = 111 }
 0x225   :  { %520 = vsyncpa [#allocation5], 1 }
 0x226   :  { %522 = vsyncpa [#allocation5 + $0x1], 1 }
 0x227   :  { %523 = vsyncpa [#allocation8], 1 }
 0x228   :  { %525 = vsyncpa [#allocation8 + $0x1], 1 }
 0x229   :  { %526 = vsyncpa [#allocation11], 1 }
 0x22a   :  { %528 = vsyncpa [#allocation11 + $0x1], 1 }
 0x22b   :  { %529 = vsyncpa [#allocation6], 1 }
 0x22c   :  { %531 = vsyncpa [#allocation6 + $0x1], 1 }

</bundles_post_ra>
